<compile_context>
chip_gen: v5e
topology: v5e:2x2
jax: 0.10.0
libtpu: 0.0.40
codegen_flags: <defaults>
</compile_context>

<pallas_src>
import functools

import jax
import jax.numpy as jnp
from jax import lax
from jax.experimental import pallas as pl
from jax.experimental.pallas import tpu as pltpu

LRELU_SLOPE = 0.1
ACT_DTYPE = jnp.bfloat16        # inter-layer activation storage dtype
_HALO = 16                      # halo block rows (>= max total (k-1)*d of a fused chain)
_TIME_TILE = 512                # max time-tile rows per grid step


def _round_up(x, m):
    return (x + m - 1) // m * m


def get_padding(kernel_size, dilation=1):
    return (kernel_size * dilation - dilation) // 2


# ---------------------------------------------------------------------------
# Pallas kernel: fused chain of 1..2 stride-1 convolutions on a channels-last
# time tile.  Per grid step (b, i):
#   xt  = [main tile (tm rows) ; halo tile (_HALO rows)]                 (bf16)
#   per stage s:  y = sum_j dot(leaky?(x)[j*d : j*d + L], W_s[j]) + b_s  (f32 acc)
#   out = (y [+ residual from xt]) * scale  [tanh]   -> bf16 / f32 store
# ---------------------------------------------------------------------------
def _tap_contrib(a, wk):
    """a: (L, cin), wk: (cin, cout) -> (L, cout) f32 contribution of one tap."""
    cin, cout = wk.shape
    if cin == 1:                                    # outer product -> VPU broadcast
        return a.astype(jnp.float32) * wk.astype(jnp.float32)
    if cout == 1:                                   # row reduction -> VPU/XLU, keeps MXU off 1-col matmuls
        return jnp.sum(a.astype(jnp.float32) * wk[:, 0].astype(jnp.float32)[None, :],
                       axis=-1, keepdims=True)
    return jnp.dot(a, wk, preferred_element_type=jnp.float32)


def _conv_chain_kernel(*refs, stages, c1, two_inputs, residual, res_offset,
                       out_scale, final_tanh):
    xt = jnp.concatenate([refs[0][...], refs[1][...]], axis=0)      # (tm + HALO, C1)
    p = 2
    xt2 = None
    if two_inputs:
        xt2 = jnp.concatenate([refs[2][...], refs[3][...]], axis=0)  # (tm + HALO, C2)
        p = 4
    out_ref = refs[-1]
    tm = out_ref.shape[0]

    need = tm + sum((k - 1) * d for (k, d, _) in stages)
    cur = None
    for si, (k, d, pre_slope) in enumerate(stages):
        w = refs[p][...]                        # (k, cin_total, cout) bf16
        b = refs[p + 1][...]                    # (1, cout) f32
        p += 2
        l_out = need - (k - 1) * d
        cout = w.shape[-1]
        acc = jnp.zeros((l_out, cout), jnp.float32)
        if si == 0:
            src = xt if pre_slope is None else jnp.where(xt >= 0, xt, xt * pre_slope)
            src2 = None
            if two_inputs:
                src2 = xt2 if pre_slope is None else jnp.where(xt2 >= 0, xt2, xt2 * pre_slope)
            for j in range(k):
                if two_inputs:
                    acc = acc + _tap_contrib(src[j * d: j * d + l_out], w[j, :c1, :])
                    acc = acc + _tap_contrib(src2[j * d: j * d + l_out], w[j, c1:, :])
                else:
                    acc = acc + _tap_contrib(src[j * d: j * d + l_out], w[j])
        else:
            srcf = cur if pre_slope is None else jnp.where(cur >= 0, cur, cur * pre_slope)
            src = srcf.astype(ACT_DTYPE)
            for j in range(k):
                acc = acc + _tap_contrib(src[j * d: j * d + l_out], w[j])
        cur = acc + b
        need = l_out

    out = cur                                    # (tm, cout_last) f32
    if residual:
        out = out + xt[res_offset: res_offset + tm, :].astype(jnp.float32)
    if out_scale != 1.0:
        out = out * jnp.float32(out_scale)
    if final_tanh:
        out = jnp.tanh(out)
    out_ref[...] = out.astype(out_ref.dtype)


def conv_chain(x, stages, *, pad_left, t_out, x2=None, residual=False,
               out_scale=1.0, final_tanh=False, out_dtype=ACT_DTYPE):
    """Fused chain of stride-1 convolutions on channels-last x (B, T, C).

    stages: list of (w, b, k, d, pre_slope); w: (k, Cin, Cout), b: (Cout,) or None.
    pad_left: zeros conceptually left of x (sum of the per-stage 'same' pads);
              output row q consumes padded rows [q, q + total_halo].
    """
    assert not (residual and x2 is not None)
    B, T, C1 = x.shape
    C2 = 0 if x2 is None else x2.shape[2]
    if x2 is not None:
        assert x2.shape[0] == B and x2.shape[1] == T

    total_halo = sum((k - 1) * d for (_, _, k, d, _) in stages)
    halo = max(_HALO, _round_up(total_halo, _HALO))
    tm = _round_up(min(_TIME_TILE, _round_up(t_out, halo)), halo)
    nt = -(-t_out // tm)
    t_padded = nt * tm + halo
    hb = tm // halo

    def prep(a):
        right = t_padded - pad_left - a.shape[1]
        assert right >= 0
        return jnp.pad(a.astype(ACT_DTYPE), ((0, 0), (pad_left, right), (0, 0)))

    inputs, in_specs = [], []

    def add_input(a, c):
        ap = prep(a)
        inputs.extend([ap, ap])                       # same array, two views
        in_specs.append(pl.BlockSpec((None, tm, c), lambda b, i: (b, i, 0)))
        in_specs.append(pl.BlockSpec((None, halo, c), lambda b, i: (b, (i + 1) * hb, 0)))

    add_input(x, C1)
    if x2 is not None:
        add_input(x2, C2)

    stage_cfg = []
    cin_expect = C1 + C2
    cout_last = None
    flops = 0
    for (w, b, k, d, pre_slope) in stages:
        kk, cin_w, cout = w.shape
        assert kk == k and cin_w == cin_expect
        if b is None:
            b = jnp.zeros((cout,), jnp.float32)
        inputs.append(w.astype(ACT_DTYPE))
        inputs.append(jnp.asarray(b, jnp.float32).reshape(1, cout))
        in_specs.append(pl.BlockSpec((k, cin_w, cout), lambda b_, i: (0, 0, 0)))
        in_specs.append(pl.BlockSpec((1, cout), lambda b_, i: (0, 0)))
        stage_cfg.append((k, d, pre_slope))
        flops += 2 * B * nt * tm * k * cin_w * cout
        cin_expect = cout
        cout_last = cout
    if residual:
        assert cout_last == C1

    out_rows = nt * tm
    out_bytes = 2 if out_dtype == ACT_DTYPE else 4
    cost = pl.CostEstimate(
        flops=int(flops),
        transcendentals=int(B * out_rows * cout_last) if final_tanh else 0,
        bytes_accessed=int(B * t_padded * (C1 + C2) * 2
                           + B * out_rows * cout_last * out_bytes),
    )

    cmax = max([C1 + C2] + [w.shape[2] for (w, _, _, _, _) in stages])
    footprint = 6 * (tm + halo) * cmax * 4 + 4 * tm * cout_last * 4
    vmem_limit = int(min(48 * 2 ** 20, max(32 * 2 ** 20, 4 * footprint)))

    kernel = functools.partial(
        _conv_chain_kernel, stages=tuple(stage_cfg), c1=C1,
        two_inputs=x2 is not None, residual=residual, res_offset=pad_left,
        out_scale=float(out_scale), final_tanh=final_tanh)

    out = pl.pallas_call(
        kernel,
        out_shape=jax.ShapeDtypeStruct((B, out_rows, cout_last), out_dtype),
        grid=(B, nt),
        in_specs=in_specs,
        out_specs=pl.BlockSpec((None, tm, cout_last), lambda b, i: (b, i, 0)),
        compiler_params=pltpu.CompilerParams(
            dimension_semantics=("parallel", "parallel"),
            vmem_limit_bytes=vmem_limit),
        cost_estimate=cost,
    )(*inputs)
    return out[:, :t_out, :]


# ---------------------------------------------------------------------------
# Layer wrappers (channels-last everywhere)
# ---------------------------------------------------------------------------
def conv_same(x, p, *, dilation=1, pre_slope=None, x2=None, residual=False,
              out_scale=1.0, final_tanh=False, out_dtype=ACT_DTYPE):
    pad = get_padding(p["k"], dilation)
    return conv_chain(x, [(p["w"], p["b"], p["k"], dilation, pre_slope)],
                      pad_left=pad, t_out=x.shape[1], x2=x2, residual=residual,
                      out_scale=out_scale, final_tanh=final_tanh, out_dtype=out_dtype)


def conv_transpose_poly(x, p, *, pre_slope=None):
    """Polyphase ConvTranspose1d: one short conv + free phase-interleave reshape."""
    B, T, _ = x.shape
    y = conv_chain(x, [(p["w"], p["b"], p["k"], 1, pre_slope)],
                   pad_left=p["pad_left"], t_out=T)
    return y.reshape(B, T * p["stride"], p["cout"])


def conv_strided_poly(x, p):
    """Strided Conv1d via the free (B,T,C)->(B,T/u,u*C) reshape + short conv."""
    B, T, C = x.shape
    u, pad, k0 = p["stride"], p["pad_orig"], p["k_orig"]
    t_out = (T + 2 * pad - k0) // u + 1
    t_up = _round_up(T, u)
    if t_up != T:
        x = jnp.pad(x, ((0, 0), (0, t_up - T), (0, 0)))
    xpoly = x.reshape(B, t_up // u, u * C)
    return conv_chain(xpoly, [(p["w"], p["b"], p["k"], 1, None)],
                      pad_left=p["pad_left"], t_out=t_out)


def resblock_forward(p, x, out_scale_last=1.0):
    if p["kind"] == "1":
        pairs = list(zip(p["convs1"], p["convs2"]))
        for idx, (c1, c2) in enumerate(pairs):
            scale = out_scale_last if idx == len(pairs) - 1 else 1.0
            pad = get_padding(c1["k"], c1["dil"]) + get_padding(c2["k"], c2["dil"])
            x = conv_chain(
                x,
                [(c1["w"], c1["b"], c1["k"], c1["dil"], LRELU_SLOPE),
                 (c2["w"], c2["b"], c2["k"], c2["dil"], LRELU_SLOPE)],
                pad_left=pad, t_out=x.shape[1], residual=True, out_scale=scale)
    else:
        convs = p["convs"]
        for idx, c in enumerate(convs):
            scale = out_scale_last if idx == len(convs) - 1 else 1.0
            x = conv_chain(x, [(c["w"], c["b"], c["k"], c["dil"], LRELU_SLOPE)],
                           pad_left=get_padding(c["k"], c["dil"]), t_out=x.shape[1],
                           residual=True, out_scale=scale)
    return x


# ---------------------------------------------------------------------------
# Parameters (weights prepared once in per-tap (k, Cin, Cout) / polyphase form)
# ---------------------------------------------------------------------------
_SCALE = 0.05


def _conv_w(key, cin, cout, k, bias=True):
    kw, kb = jax.random.split(key)
    w = jax.random.normal(kw, (cout, cin, k), jnp.float32) * _SCALE       # torch layout
    wc = jnp.transpose(w, (2, 1, 0))                                      # (k, cin, cout)
    b = jax.random.normal(kb, (cout,), jnp.float32) * _SCALE if bias else None
    return {"w": wc, "b": b, "k": k}


def _convT_poly_w(key, cin, cout, k, stride, padding):
    """ConvTranspose1d -> polyphase weights: one conv to (stride*cout) channels."""
    kw, kb = jax.random.split(key)
    wt = jax.random.normal(kw, (cin, cout, k), jnp.float32) * _SCALE      # torch layout
    b = jax.random.normal(kb, (cout,), jnp.float32) * _SCALE
    s, p = stride, padding
    assert k - 2 * p == s, "polyphase path assumes out_len == T*stride (HiFi-GAN configs)"
    infos = []
    for r in range(s):
        j0 = (r + p) % s
        js = list(range(j0, k, s))
        base = (r + p) // s
        infos.append((js, base))
    left = max(len(js) - 1 - base for js, base in infos)
    right = max(base for _, base in infos)
    frame = left + right + 1
    wc = jnp.zeros((frame, cin, s * cout), jnp.float32)
    for r, (js, base) in enumerate(infos):
        for m, j in enumerate(js):
            fpos = (base - m) + left
            wc = wc.at[fpos, :, r * cout:(r + 1) * cout].set(wt[:, :, j])
    bc = jnp.tile(b, s)
    return {"w": wc, "b": bc, "k": frame, "pad_left": left, "stride": s, "cout": cout}


def _strided_conv_poly_w(key, cin, cout, k, stride, padding, bias=True):
    """Strided Conv1d -> polyphase weights acting on the (T/u, u*cin) reshape."""
    kw, kb = jax.random.split(key)
    w = jax.random.normal(kw, (cout, cin, k), jnp.float32) * _SCALE       # torch layout
    b = jax.random.normal(kb, (cout,), jnp.float32) * _SCALE if bias else None
    u, p = stride, padding
    amin = (0 - p) // u
    amax = (k - 1 - p) // u
    kk = amax - amin + 1
    wc = jnp.zeros((kk, u * cin, cout), jnp.float32)
    for j in range(k):
        a = (j - p) // u
        c = (j - p) - a * u
        wc = wc.at[a - amin, c * cin:(c + 1) * cin, :].set(jnp.transpose(w[:, :, j]))
    return {"w": wc, "b": b, "k": kk, "pad_left": -amin,
            "stride": u, "pad_orig": p, "k_orig": k}


def _init_resblock1(key, ch, ksz, dils):
    convs1, convs2 = [], []
    for d in dils:
        key, k1, k2 = jax.random.split(key, 3)
        c1 = _conv_w(k1, ch, ch, ksz); c1["dil"] = d
        c2 = _conv_w(k2, ch, ch, ksz); c2["dil"] = 1
        convs1.append(c1); convs2.append(c2)
    return {"kind": "1", "convs1": convs1, "convs2": convs2}


def _init_resblock2(key, ch, ksz, dils):
    convs = []
    for d in dils:
        key, k1 = jax.random.split(key)
        c = _conv_w(k1, ch, ch, ksz); c["dil"] = d
        convs.append(c)
    return {"kind": "2", "convs": convs}


def init_params(key, hps):
    nh2 = hps["n_harmonic"] + 2
    nu = len(hps["upsample_rates"])
    uic = hps["upsample_initial_channel"]
    params = {}

    key, k1 = jax.random.split(key)
    params["sin_prenet"] = _conv_w(k1, 1, nh2, 3)

    dec = {}
    key, kl, kc = jax.random.split(key, 3)
    kw, kb = jax.random.split(kl)
    w_lin = jax.random.normal(kw, (hps["hifi_dim"], hps["hubert_dim"]), jnp.float32) * _SCALE
    dec["lin_pre"] = {
        "w": jnp.transpose(w_lin).reshape(1, hps["hubert_dim"], hps["hifi_dim"]),
        "b": jax.random.normal(kb, (hps["hifi_dim"],), jnp.float32) * _SCALE,
        "k": 1,
    }
    dec["conv_pre"] = _conv_w(kc, hps["hifi_dim"], uic, 7)

    downs, rbd = [], []
    for i in range(nu):
        j = nu - 1 - i
        u = hps["upsample_rates"][j]
        ksz = hps["upsample_kernel_sizes"][j]
        key, ka, kb2 = jax.random.split(key, 3)
        downs.append(_strided_conv_poly_w(ka, nh2, nh2, ksz, u, ksz // 2))
        c = _conv_w(kb2, nh2, nh2, 3); c["dil"] = 1
        rbd.append({"kind": "2", "convs": [c]})             # ResBlock3
    dec["downs"] = downs
    dec["resblocks_downs"] = rbd

    key, kcp = jax.random.split(key)
    dec["concat_pre"] = _conv_w(kcp, uic + nh2, uic, 3)

    ups, ccs, rbs = [], [], []
    for i in range(nu):
        ch = uic // (2 ** (i + 1))
        u = hps["upsample_rates"][i]
        ksz = hps["upsample_kernel_sizes"][i]
        key, ka, kb2 = jax.random.split(key, 3)
        ups.append(_convT_poly_w(ka, uic // (2 ** i), ch, ksz, u, (ksz - u) // 2))
        ccs.append(_conv_w(kb2, ch + nh2, ch, 3, bias=False))
        for rksz, dils in zip(hps["resblock_kernel_sizes"], hps["resblock_dilation_sizes"]):
            key, kr = jax.random.split(key)
            if hps["resblock"] == "1":
                rbs.append(_init_resblock1(kr, ch, rksz, dils))
            else:
                rbs.append(_init_resblock2(kr, ch, rksz, dils))
    dec["ups"] = ups
    dec["concat_conv"] = ccs
    dec["resblocks"] = rbs

    key, kp = jax.random.split(key)
    dec["conv_post"] = _conv_w(kp, uic // (2 ** nu), 1, 7, bias=False)
    params["dec"] = dec
    return params


# ---------------------------------------------------------------------------
# Forward passes (channels-last (B, T, C) everywhere)
# ---------------------------------------------------------------------------
def generator_forward(params, hps, mel, ddsp):
    nu = len(hps["upsample_rates"])
    nk = hps["num_kernels"]
    B, T, _ = mel.shape

    lp = params["lin_pre"]
    h = conv_chain(mel, [(lp["w"], lp["b"], 1, 1, None)], pad_left=0, t_out=T)
    h = conv_same(h, params["conv_pre"])

    se = ddsp
    res_features = [se]
    for i in range(nu):
        in_size = se.shape[1]
        u = hps["upsample_rates"][nu - 1 - i]
        se = conv_strided_poly(se, params["downs"][i])
        se = resblock_forward(params["resblocks_downs"][i], se)
        se = se[:, : in_size // u, :]
        res_features.append(se)

    h = conv_same(h, params["concat_pre"], x2=se)        # fused [h, se] concat

    for i in range(nu):
        # F.leaky_relu(x, 0.1) fused as pre-activation of the polyphase ConvT
        h = conv_transpose_poly(h, params["ups"][i], pre_slope=LRELU_SLOPE)
        h = conv_same(h, params["concat_conv"][i], x2=res_features[nu - 1 - i])
        xs = None
        for jk in range(nk):
            r = resblock_forward(params["resblocks"][i * nk + jk], h,
                                 out_scale_last=1.0 / nk)   # /num_kernels folded in
            xs = r if xs is None else xs + r
        h = xs

    cp = params["conv_post"]
    out = conv_chain(h, [(cp["w"], cp["b"], cp["k"], 1, 0.01)],   # default leaky slope
                     pad_left=get_padding(cp["k"], 1), t_out=h.shape[1],
                     final_tanh=True, out_dtype=jnp.float32)
    return jnp.transpose(out, (0, 2, 1))                  # (B, 1, T_wave) like torch


def synthesizer_forward(params, hps, mel, f0):
    """mel: (B, T_mel, hubert_dim); f0: (B, T_mel, 1). Returns (B, 1, T_mel*hop)."""
    B, t_mel, _ = mel.shape
    hop = hps["hop_size"]
    sr = hps["sampling_rate"]

    # nearest-neighbor upsample of f0 by hop, then wrapped phase accumulation.
    pitch = jnp.repeat(f0, hop, axis=1)                                   # (B, T_wave, 1)
    inc = (pitch[..., 0] / sr).reshape(B, t_mel, hop)
    within = jnp.cumsum(inc, axis=-1)                                     # in-block cumsum
    block_tot = within[:, :, -1]

    def step(carry, s):
        nxt = carry + s
        nxt = nxt - jnp.floor(nxt)                                        # keep phase wrapped
        return nxt, carry

    _, prefix = lax.scan(step, jnp.zeros((B,), jnp.float32), jnp.transpose(block_tot))
    phase = prefix.T[:, :, None] + within                                 # (B, T_mel, hop)
    f0_wave = jnp.sin(2.0 * jnp.pi * phase).reshape(B, t_mel * hop, 1)
    cond = conv_same(f0_wave, params["sin_prenet"])                       # (B, T_wave, nh+2)
    return generator_forward(params["dec"], hps, mel, cond)


# ---------------------------------------------------------------------------
# Small deterministic example
# ---------------------------------------------------------------------------
HPS = {
    "hubert_dim": 32,
    "hifi_dim": 32,
    "upsample_initial_channel": 64,
    "upsample_rates": [4, 4],
    "upsample_kernel_sizes": [8, 8],
    "resblock": "1",
    "resblock_kernel_sizes": [3],
    "resblock_dilation_sizes": [[1, 3, 5]],
    "n_harmonic": 6,
    "hop_size": 16,          # == prod(upsample_rates)
    "sampling_rate": 16000,
}
HPS["num_kernels"] = len(HPS["resblock_kernel_sizes"])
HPS["num_upsamples"] = len(HPS["upsample_rates"])


if __name__ == "__main__":
    key = jax.random.PRNGKey(0)
    key, kparam, kmel, kf0 = jax.random.split(key, 4)

    params = init_params(kparam, HPS)

    B, T_mel = 2, 8
    mel = jax.random.normal(kmel, (B, T_mel, HPS["hubert_dim"]), jnp.float32)
    f0 = jax.random.uniform(kf0, (B, T_mel, 1), jnp.float32, 80.0, 400.0)

    wav = synthesizer_forward(params, HPS, mel, f0)
    jax.block_until_ready(wav)

    expected = (B, 1, T_mel * HPS["hop_size"])
    assert wav.shape == expected, (wav.shape, expected)
    assert bool(jnp.all(jnp.isfinite(wav)))
    print("KERNEL_OK")
</pallas_src>

<mosaic_0001>
module attributes {stable_mosaic.version = 11 : i64} {
  func.func @_conv_chain_kernel(%arg0: i32, %arg1: i32, %arg2: memref<1x128x1xbf16, #tpu.memory_space<vmem>>, %arg3: memref<1x16x1xbf16, #tpu.memory_space<vmem>>, %arg4: memref<3x1x8xbf16, #tpu.memory_space<vmem>>, %arg5: memref<1x8xf32, #tpu.memory_space<vmem>>, %arg6: memref<1x128x8xbf16, #tpu.memory_space<vmem>>) attributes {dimension_semantics = [#tpu.dimension_semantics<parallel>, #tpu.dimension_semantics<parallel>], iteration_bounds = array<i64: 2, 1>, scalar_prefetch = 0 : i64, scratch_operands = 0 : i64, tpu.core_type = #tpu.core_type<tc>, window_params = [{transform_indices = @transform_0, window_bounds = array<i64: 1, 128, 1>}, {transform_indices = @transform_1, window_bounds = array<i64: 1, 16, 1>}, {pipeline_mode = #tpu.pipeline_mode<synchronous>, transform_indices = @transform_2, window_bounds = array<i64: 3, 1, 8>}, {pipeline_mode = #tpu.pipeline_mode<synchronous>, transform_indices = @transform_3, window_bounds = array<i64: 1, 8>}, {transform_indices = @transform_4, window_bounds = array<i64: 1, 128, 8>}]} {
    %c0 = arith.constant 0 : index
    %c0_0 = arith.constant 0 : index
    %c0_1 = arith.constant 0 : index
    %0 = vector.load %arg2[%c0, %c0_0, %c0_1] : memref<1x128x1xbf16, #tpu.memory_space<vmem>>, vector<1x128x1xbf16>
    %1 = vector.shape_cast %0 : vector<1x128x1xbf16> to vector<128x1xbf16>
    %c0_2 = arith.constant 0 : index
    %c0_3 = arith.constant 0 : index
    %c0_4 = arith.constant 0 : index
    %2 = vector.load %arg3[%c0_2, %c0_3, %c0_4] : memref<1x16x1xbf16, #tpu.memory_space<vmem>>, vector<1x16x1xbf16>
    %3 = vector.shape_cast %2 : vector<1x16x1xbf16> to vector<16x1xbf16>
    %4 = tpu.concatenate %1, %3 in 0 : vector<128x1xbf16>, vector<16x1xbf16> -> vector<144x1xbf16>
    %c0_5 = arith.constant 0 : index
    %c0_6 = arith.constant 0 : index
    %c0_7 = arith.constant 0 : index
    %5 = vector.load %arg4[%c0_5, %c0_6, %c0_7] : memref<3x1x8xbf16, #tpu.memory_space<vmem>>, vector<3x1x8xbf16>
    %c0_8 = arith.constant 0 : index
    %c0_9 = arith.constant 0 : index
    %6 = vector.load %arg5[%c0_8, %c0_9] : memref<1x8xf32, #tpu.memory_space<vmem>>, vector<1x8xf32>
    %cst = arith.constant 0.000000e+00 : f32
    %7 = vector.broadcast %cst : f32 to vector<128x8xf32>
    %8 = vector.extract_strided_slice %4 {offsets = [0, 0], sizes = [128, 1], strides = [1, 1]} : vector<144x1xbf16> to vector<128x1xbf16>
    %9 = vector.extract_strided_slice %5 {offsets = [0, 0, 0], sizes = [1, 1, 8], strides = [1, 1, 1]} : vector<3x1x8xbf16> to vector<1x1x8xbf16>
    %10 = vector.shape_cast %9 : vector<1x1x8xbf16> to vector<1x8xbf16>
    %11 = arith.extf %8 : vector<128x1xbf16> to vector<128x1xf32>
    %12 = arith.extf %10 : vector<1x8xbf16> to vector<1x8xf32>
    %13 = vector.broadcast %11 : vector<128x1xf32> to vector<128x8xf32>
    %14 = vector.broadcast %12 : vector<1x8xf32> to vector<128x8xf32>
    %15 = arith.mulf %13, %14 : vector<128x8xf32>
    %16 = arith.addf %7, %15 : vector<128x8xf32>
    %17 = vector.extract_strided_slice %4 {offsets = [1, 0], sizes = [128, 1], strides = [1, 1]} : vector<144x1xbf16> to vector<128x1xbf16>
    %18 = vector.extract_strided_slice %5 {offsets = [1, 0, 0], sizes = [1, 1, 8], strides = [1, 1, 1]} : vector<3x1x8xbf16> to vector<1x1x8xbf16>
    %19 = vector.shape_cast %18 : vector<1x1x8xbf16> to vector<1x8xbf16>
    %20 = arith.extf %17 : vector<128x1xbf16> to vector<128x1xf32>
    %21 = arith.extf %19 : vector<1x8xbf16> to vector<1x8xf32>
    %22 = vector.broadcast %20 : vector<128x1xf32> to vector<128x8xf32>
    %23 = vector.broadcast %21 : vector<1x8xf32> to vector<128x8xf32>
    %24 = arith.mulf %22, %23 : vector<128x8xf32>
    %25 = arith.addf %16, %24 : vector<128x8xf32>
    %26 = vector.extract_strided_slice %4 {offsets = [2, 0], sizes = [128, 1], strides = [1, 1]} : vector<144x1xbf16> to vector<128x1xbf16>
    %27 = vector.extract_strided_slice %5 {offsets = [2, 0, 0], sizes = [1, 1, 8], strides = [1, 1, 1]} : vector<3x1x8xbf16> to vector<1x1x8xbf16>
    %28 = vector.shape_cast %27 : vector<1x1x8xbf16> to vector<1x8xbf16>
    %29 = arith.extf %26 : vector<128x1xbf16> to vector<128x1xf32>
    %30 = arith.extf %28 : vector<1x8xbf16> to vector<1x8xf32>
    %31 = vector.broadcast %29 : vector<128x1xf32> to vector<128x8xf32>
    %32 = vector.broadcast %30 : vector<1x8xf32> to vector<128x8xf32>
    %33 = arith.mulf %31, %32 : vector<128x8xf32>
    %34 = arith.addf %25, %33 : vector<128x8xf32>
    %35 = vector.broadcast %6 : vector<1x8xf32> to vector<128x8xf32>
    %36 = arith.addf %34, %35 : vector<128x8xf32>
    %37 = arith.truncf %36 : vector<128x8xf32> to vector<128x8xbf16>
    %c0_10 = arith.constant 0 : index
    %c0_11 = arith.constant 0 : index
    %c0_12 = arith.constant 0 : index
    %38 = vector.load %arg6[%c0_10, %c0_11, %c0_12] : memref<1x128x8xbf16, #tpu.memory_space<vmem>>, vector<1x128x8xbf16>
    %39 = vector.shape_cast %38 : vector<1x128x8xbf16> to vector<128x8xbf16>
    %40 = vector.shape_cast %37 : vector<128x8xbf16> to vector<1x128x8xbf16>
    tpu.vector_store %arg6[%c0_10, %c0_11, %c0_12], %40 {strides = array<i32>} : memref<1x128x8xbf16, #tpu.memory_space<vmem>>, vector<1x128x8xbf16>,
    return
  }
  func.func @transform_0(%arg0: i32, %arg1: i32) -> (i32, i32, i32) {
    %c0_i32 = arith.constant 0 : i32
    %c0_i32_0 = arith.constant 0 : i32
    return %arg0, %arg1, %c0_i32 : i32, i32, i32
  }
  func.func @transform_1(%arg0: i32, %arg1: i32) -> (i32, i32, i32) {
    %c1_i32 = arith.constant 1 : i32
    %0 = arith.addi %arg1, %c1_i32 : i32
    %c8_i32 = arith.constant 8 : i32
    %1 = arith.muli %0, %c8_i32 : i32
    %c0_i32 = arith.constant 0 : i32
    %c0_i32_0 = arith.constant 0 : i32
    return %arg0, %1, %c0_i32 : i32, i32, i32
  }
  func.func @transform_2(%arg0: i32, %arg1: i32) -> (i32, i32, i32) {
    %c0_i32 = arith.constant 0 : i32
    %c0_i32_0 = arith.constant 0 : i32
    %c0_i32_1 = arith.constant 0 : i32
    %c0_i32_2 = arith.constant 0 : i32
    return %c0_i32, %c0_i32_0, %c0_i32_1 : i32, i32, i32
  }
  func.func @transform_3(%arg0: i32, %arg1: i32) -> (i32, i32) {
    %c0_i32 = arith.constant 0 : i32
    %c0_i32_0 = arith.constant 0 : i32
    %c0_i32_1 = arith.constant 0 : i32
    return %c0_i32, %c0_i32_0 : i32, i32
  }
  func.func @transform_4(%arg0: i32, %arg1: i32) -> (i32, i32, i32) {
    %c0_i32 = arith.constant 0 : i32
    %c0_i32_0 = arith.constant 0 : i32
    return %arg0, %arg1, %c0_i32 : i32, i32, i32
  }
}

</mosaic_0001>

<bundles_post_ra>
// kernel: tpu_custom_call.1
= control target key start
LH: loop header
LB: loop body
LE: loop exit
PB: predicated region body
PF: predicated region fallthrough
CT: control target
= control target key end

     0   :  { %s1061_s15 = smov 0   ;;  %s1063_s16 = smov 0   ;;  %s1324_s0 = inlined_call_operand.vmem [shape: bf16[2,144,1], index: 0, kind: input, shape index: {}]   ;;  %s1325_s1 = inlined_call_operand.vmem [shape: bf16[2,144,1], index: 1, kind: input, shape index: {}]   ;;  %s1326_s2 = inlined_call_operand.vmem [shape: bf16[3,1,8], index: 2, kind: input, shape index: {}]   ;;  %s1327_s3 = inlined_call_operand.vmem [shape: f32[1,8], index: 3, kind: input, shape index: {}]   ;;  %s1328_s4 = inlined_call_operand.vmem [shape: bf16[2,128,8], index: 4, kind: output, shape index: {}]  }
   0x1   :  { %s1065_s17 = smov 0  }
   0x2 LB: > { %s26_s18 = sadd.s32 1, %s1029_s16  ;;  %p884_p0 = scmp.ge.s32.totalorder %s1033_s17, 1  ;;  %s1033_s17 = sphi %s1065_s17, %s14_s17   ;;  %s1029_s16 = sphi %s1063_s16, %s1330_s16   ;;  %s1025_s15 = sphi %s1061_s15, %s1329_s15  }
   0x3   : > { %p28_p1 = scmp.ge.s32.totalorder %s26_s18, 2  ;;  %p216_p2 = scmp.lt.s32.totalorder %s1033_s17, 3 }
   0x5   : > { %s1332_s18 = smov (%p28_p1, %s26_s18), 0  ;;  %p217_p3 = pnand %p884_p0, %p216_p2 }
   0x6   : > { %p270_p4 = scmp.lt.s32.totalorder (!%p217_p3), %s1025_s15, 1 }
   0x7   : > { %220 = sbr.rel (%p217_p3) target bundleno = 182 (0xb6), region = 36 }
   0xc   : > { %v1035_v0 = vmov 0   ;;  %s1334_s15 = smov (!%p270_p4, %s1025_s15), 1  ;;  %v380_v35 = vld [vmem:[%s1326_s2 + $0x1] sm:$0x1]  ;;  %v381_v36 = vld [vmem:[%s1326_s2 + $0x2] sm:$0x1] }
   0xd   : > { %978 = vset.pattern.permute.xlu1 %v1035_v0  ;;  %967 = vset.pattern.permute.xlu0 %v1035_v0  ;;  %s939_s19 = smul.u32 72, %s1334_s15  ;;  %v514_v37 = vunpack.c.l.bf16 %v380_v35  ;;  %v621_v38 = vunpack.c.l.bf16 %v381_v36  ;;  %v379_v39 = vld [vmem:[%s1326_s2] sm:$0x1]  ;;  %vm555_vm0 = vcmask 1046528   ;;  %vm657_vm1 = vcmask 1045504   ;;  %s929_s9 = sshll.u32 %s1334_s15, 6 }
   0xe   : > { %989 = vset.pattern.permute.xlu2 %v1035_v0  ;;  %v399_v40 = vunpack.c.l.bf16 %v379_v39  ;;  %v1127_v59 = vld [vmem:[%s1327_s3] ss:$0 sm:$0xff]  ;;  %s1150_s12 = scalar_lea.vmem %s1328_s4, %s929_s9  ;;  %vm758_vm2 = vcmask 60416  }
   0xf   : > { %s277_s22 = scalar_lea.vmem %s1324_s0, %s939_s19  ;;  %s928_s23 = sadd.s32 64, %s939_s19  ;;  %v1101_v41 = vperm.slane %v514_v37, 0  ;;  %v1103_v42 = vperm.slane %v621_v38, 0 }
  0x10   : > { %v932_v1 = vld [vmem:[%s277_s22 + $0x10] sm:$0xff]  ;;  %v930_v2 = vld [vmem:[%s277_s22] sm:$0xff]  ;;  %v933_v3 = vld [vmem:[%s277_s22 + $0x18] sm:$0xff]  ;;  %s293_s26 = scalar_lea.vmem %s1325_s1, %s928_s23  ;;  %v1105_v46 = vperm.slane %v399_v40, 0 }
  0x11   : > { %v934_v4 = vld [vmem:[%s277_s22 + $0x20] sm:$0xff]  ;;  %v387_v5 = vunpack.c.l.bf16 %v932_v1  ;;  %v388_v6 = vunpack.c.h.bf16 %v932_v1  ;;  %v383_v7 = vunpack.c.l.bf16 %v930_v2  ;;  %v384_v8 = vunpack.c.h.bf16 %v930_v2  ;;  %v931_v9 = vld [vmem:[%s277_s22 + $0x8] sm:$0xff]  ;;  %v937_v24 = vld [vmem:[%s277_s22 + $0x38] sm:$0xff] }
  0x12   : > { %v391_v12 = vunpack.c.l.bf16 %v934_v4  ;;  %v392_v13 = vunpack.c.h.bf16 %v934_v4  ;;  %v935_v14 = vld [vmem:[%s277_s22 + $0x28] sm:$0xff]  ;;  %v389_v15 = vunpack.c.l.bf16 %v933_v3  ;;  %v390_v16 = vunpack.c.h.bf16 %v933_v3  ;;  %v936_v25 = vld [vmem:[%s277_s22 + $0x30] sm:$0xff]  ;;  %v938_v31 = vld [vmem:[%s293_s26] sm:$0xf] }
  0x13   : > { %v979_v10 = vpack.i.bf16 %v388_v6, %v387_v5  ;;  %v968_v11 = vpack.i.bf16 %v384_v8, %v383_v7  ;;  %v385_v17 = vunpack.c.l.bf16 %v931_v9  ;;  %v386_v18 = vunpack.c.h.bf16 %v931_v9 }
  0x14   : > { %v990_v19 = vpack.i.bf16 %v392_v13, %v391_v12  ;;  %v393_v20 = vunpack.c.l.bf16 %v935_v14  ;;  %v394_v21 = vunpack.c.h.bf16 %v935_v14  ;;  %v984_v22 = vpack.i.bf16 %v390_v16, %v389_v15 }
  0x15   : > { %980 = vperm.xlu1 %978, %v979_v10   ;;  %969 = vperm.xlu0 %967, %v968_v11   ;;  %v973_v23 = vpack.i.bf16 %v386_v18, %v385_v17  ;;  %v397_v27 = vunpack.c.l.bf16 %v937_v24  ;;  %v398_v28 = vunpack.c.h.bf16 %v937_v24  ;;  %v395_v29 = vunpack.c.l.bf16 %v936_v25 }
  0x16   : > { %991 = vperm.xlu2 %989, %v990_v19   ;;  %v995_v26 = vpack.i.bf16 %v394_v21, %v393_v20  ;;  %v396_v30 = vunpack.c.h.bf16 %v936_v25  ;;  %v513_v34 = vunpack.c.l.bf16 %v938_v31 }
  0x17   : > { %v1005_v32 = vpack.i.bf16 %v398_v28, %v397_v27 }
  0x18   : > { %v1000_v33 = vpack.i.bf16 %v396_v30, %v395_v29 }
  0x1d   : > { %985 = vperm.xlu1 %978, %v984_v22   ;;  %974 = vperm.xlu0 %967, %v973_v23  }
  0x1e   : > { %996 = vperm.xlu2 %989, %v995_v26  }
  0x25   : > { %1006 = vperm.xlu1 %978, %v1005_v32   ;;  %1001 = vperm.xlu0 %967, %v1000_v33  }
  0x26   : > { %517 = vperm.xlu2 %989, %v513_v34  }
  0x70   : > { %v992_v43 = vpop.permute.xlu2 %991 }
  0x71   : > { %v994_v44 = vunpack.i.h.bf16 %v992_v43  ;;  %v993_v45 = vunpack.i.l.bf16 %v992_v43 }
  0x73   : > { %v530_v47 = vmul.f32 %v994_v44, %v1101_v41  ;;  %v632_v48 = vmul.f32 %v994_v44, %v1103_v42  ;;  %v1110_v49 = vmul.f32 %v993_v45, %v1101_v41  ;;  %v1113_v50 = vmul.f32 %v993_v45, %v1103_v42 }
  0x74   : > { %v489_v53 = vmul.f32 %v993_v45, %v1105_v46  ;;  %v490_v2 = vmul.f32 %v994_v44, %v1105_v46 }
  0x75   : > { %v573_v51 = vrot.slane %v530_v47, 1  ;;  %v675_v52 = vrot.slane %v632_v48, 2  ;;  %v571_v54 = vrot.slane %v1110_v49, 1  ;;  %v673_v55 = vrot.slane %v1113_v50, 2 }
  0x77   : > { %v574_v56 = vsel %vm555_vm0, %v571_v54, %v573_v51  ;;  %v676_v57 = vsel %vm657_vm1, %v673_v55, %v675_v52 }
  0x78   : > { %v997_v58 = vpop.permute.xlu2 %996  ;;  %v613_v60 = vadd.f32 %v574_v56, %v489_v53 }
  0x79   : > { %v1129_v61 = vunpack.i.h.bf16 %v997_v58  ;;  %v998_v62 = vunpack.i.l.bf16 %v997_v58 }
  0x7a   : > { %v715_v63 = vadd.f32 %v676_v57, %v613_v60 }
  0x7b   : > { %v1134_v0 = vmul.f32 %v1129_v61, %v1101_v41  ;;  %v1138_v1 = vmul.f32 %v1129_v61, %v1103_v42  ;;  %v531_v3 = vmul.f32 %v998_v62, %v1101_v41  ;;  %v633_v4 = vmul.f32 %v998_v62, %v1103_v42 }
  0x7c   : > { %v734_v5 = vadd.f32 %v1127_v59, %v715_v63  ;;  %v491_v8 = vmul.f32 %v998_v62, %v1105_v46 }
  0x7d   : > { %v577_v6 = vrot.slane %v1134_v0, 1  ;;  %v679_v7 = vrot.slane %v1138_v1, 2  ;;  %v575_v9 = vrot.slane %v531_v3, 1  ;;  %v677_v10 = vrot.slane %v633_v4, 2 }
  0x7e   : > { %v750_v11 = vpack.c.bf16 %v734_v5, %v734_v5 }
  0x7f   : > { %v576_v12 = vsel %vm555_vm0, %v573_v51, %v575_v9  ;;  %v578_v13 = vsel %vm555_vm0, %v575_v9, %v577_v6  ;;  %v678_v14 = vsel %vm657_vm1, %v675_v52, %v677_v10  ;;  %v680_v15 = vsel %vm657_vm1, %v677_v10, %v679_v7 }
  0x80   : > { %767 = vst.msk [vmem:[%s1150_s12 + $0x20] sm:$0xf] %vm758_vm2, %v750_v11  ;;  %v614_v16 = vadd.f32 %v576_v12, %v490_v2  ;;  %v615_v17 = vadd.f32 %v578_v13, %v491_v8  ;;  %v518_v20 = vpop.permute.xlu2 %517 }
  0x81   : > { %v1165_v25 = vmul.f32 %v1101_v41, %v518_v20  ;;  %v1185_v37 = vmul.f32 %v1103_v42, %v518_v20 }
  0x82   : > { %v716_v18 = vadd.f32 %v678_v14, %v614_v16  ;;  %v717_v19 = vadd.f32 %v680_v15, %v615_v17 }
  0x83   : > { %v587_v43 = vrot.slane %v1165_v25, 1 }
  0x84   : > { %v735_v21 = vadd.f32 %v1127_v59, %v716_v18  ;;  %v736_v22 = vadd.f32 %v1127_v59, %v717_v19 }
  0x86   : > { %v751_v26 = vpack.c.bf16 %v735_v21, %v735_v21  ;;  %v752_v27 = vpack.c.bf16 %v736_v22, %v736_v22 }
  0x87   : > { %v981_v23 = vpop.permute.xlu1 %980  ;;  %v970_v24 = vpop.permute.xlu0 %969 }
  0x88   : > { %v983_v28 = vunpack.i.h.bf16 %v981_v23  ;;  %v982_v29 = vunpack.i.l.bf16 %v981_v23  ;;  %v972_v30 = vunpack.i.h.bf16 %v970_v24  ;;  %v971_v31 = vunpack.i.l.bf16 %v970_v24  ;;  %768 = vst.msk [vmem:[%s1150_s12 + $0x24] sm:$0xf] %vm758_vm2, %v751_v26 }
  0x89   : > { %769 = vst.msk [vmem:[%s1150_s12 + $0x28] sm:$0xf] %vm758_vm2, %v752_v27 }
  0x8a   : > { %v526_v32 = vmul.f32 %v983_v28, %v1101_v41  ;;  %v1171_v33 = vmul.f32 %v983_v28, %v1103_v42  ;;  %v1176_v34 = vmul.f32 %v982_v29, %v1101_v41  ;;  %v1179_v35 = vmul.f32 %v982_v29, %v1103_v42 }
  0x8b   : > { %v1182_v36 = vmul.f32 %v972_v30, %v1101_v41  ;;  %v1189_v40 = vmul.f32 %v972_v30, %v1103_v42  ;;  %v521_v48 = vmul.f32 %v971_v31, %v1101_v41  ;;  %v486_v51 = vmul.f32 %v983_v28, %v1105_v46 }
  0x8c   : > { %v565_v38 = vrot.slane %v526_v32, 1  ;;  %v667_v39 = vrot.slane %v1171_v33, 2  ;;  %v563_v44 = vrot.slane %v1176_v34, 1  ;;  %v665_v45 = vrot.slane %v1179_v35, 2 }
  0x8d   : > { %v557_v47 = vrot.slane %v1182_v36, 1  ;;  %v485_v52 = vmul.f32 %v982_v29, %v1105_v46  ;;  %v659_v53 = vrot.slane %v1189_v40, 2  ;;  %v623_v56 = vmul.f32 %v971_v31, %v1103_v42 }
  0x8e   : > { %v566_v57 = vsel %vm555_vm0, %v563_v44, %v565_v38  ;;  %v1202_v58 = vmul.f32 %v972_v30, %v1105_v46  ;;  %v481_v60 = vmul.f32 %v971_v31, %v1105_v46  ;;  %v556_v62 = vrot.slane %v521_v48, 1 }
  0x8f   : > { %v986_v63 = vpop.permute.xlu1 %985  ;;  %v975_v2 = vpop.permute.xlu0 %974  ;;  %v609_v3 = vadd.f32 %v566_v57, %v485_v52  ;;  %v658_v4 = vrot.slane %v623_v56, 2  ;;  %v668_v9 = vsel %vm657_vm1, %v665_v45, %v667_v39 }
  0x90   : > { %v988_v5 = vunpack.i.h.bf16 %v986_v63  ;;  %v987_v8 = vunpack.i.l.bf16 %v986_v63  ;;  %v558_v10 = vsel %vm555_vm0, %v556_v62, %v557_v47  ;;  %v977_v11 = vunpack.i.h.bf16 %v975_v2 }
  0x91   : > { %v976_v12 = vunpack.i.l.bf16 %v975_v2  ;;  %v711_v13 = vadd.f32 %v668_v9, %v609_v3  ;;  %v605_v14 = vadd.f32 %v558_v10, %v481_v60  ;;  %v660_v15 = vsel %vm657_vm1, %v658_v4, %v659_v53 }
  0x92   : > { %v488_v16 = vmul.f32 %v988_v5, %v1105_v46  ;;  %v528_v17 = vmul.f32 %v988_v5, %v1101_v41  ;;  %v630_v18 = vmul.f32 %v988_v5, %v1103_v42  ;;  %v487_v19 = vmul.f32 %v987_v8, %v1105_v46 }
  0x93   : > { %v527_v20 = vmul.f32 %v987_v8, %v1101_v41  ;;  %v730_v21 = vadd.f32 %v1127_v59, %v711_v13  ;;  %v707_v22 = vadd.f32 %v660_v15, %v605_v14  ;;  %v629_v23 = vmul.f32 %v987_v8, %v1103_v42 }
  0x94   : > { %v484_v24 = vmul.f32 %v977_v11, %v1105_v46  ;;  %v569_v26 = vrot.slane %v528_v17, 1  ;;  %v671_v27 = vrot.slane %v630_v18, 2  ;;  %v524_v29 = vmul.f32 %v977_v11, %v1101_v41 }
  0x95   : > { %v567_v28 = vrot.slane %v527_v20, 1  ;;  %v746_v30 = vpack.c.bf16 %v730_v21, %v730_v21  ;;  %v726_v31 = vadd.f32 %v1127_v59, %v707_v22  ;;  %v669_v32 = vrot.slane %v629_v23, 2 }
  0x96   : > { %v626_v33 = vmul.f32 %v977_v11, %v1103_v42  ;;  %v572_v34 = vsel %vm555_vm0, %v569_v26, %v571_v54  ;;  %v674_v35 = vsel %vm657_vm1, %v671_v27, %v673_v55  ;;  %v561_v2 = vrot.slane %v524_v29, 1 }
  0x97   : > { %v568_v48 = vsel %vm555_vm0, %v565_v38, %v567_v28  ;;  %v570_v52 = vsel %vm555_vm0, %v567_v28, %v569_v26  ;;  %763 = vst.msk [vmem:[%s1150_s12 + $0x10] sm:$0xf] %vm758_vm2, %v746_v30  ;;  %v742_v56 = vpack.c.bf16 %v726_v31, %v726_v31  ;;  %v612_v57 = vadd.f32 %v572_v34, %v488_v16  ;;  %v1007_v4 = vpop.permute.xlu1 %1006 }
  0x98   : > { %v610_v60 = vadd.f32 %v568_v48, %v486_v51  ;;  %v611_v62 = vadd.f32 %v570_v52, %v487_v19  ;;  %v670_v63 = vsel %vm657_vm1, %v667_v39, %v669_v32  ;;  %v672_v49 = vsel %vm657_vm1, %v669_v32, %v671_v27  ;;  %v1002_v27 = vpop.permute.xlu0 %1001 }
  0x99   : > { %v663_v54 = vrot.slane %v626_v33, 2  ;;  %759 = vst.msk [vmem:[%s1150_s12] sm:$0xf] %vm758_vm2, %v742_v56  ;;  %v714_v50 = vadd.f32 %v674_v35, %v612_v57  ;;  %v483_v38 = vmul.f32 %v976_v12, %v1105_v46  ;;  %v564_v5 = vsel %vm555_vm0, %v561_v2, %v563_v44 }
  0x9a   : > { %v712_v55 = vadd.f32 %v670_v63, %v610_v60  ;;  %v713_v3 = vadd.f32 %v672_v49, %v611_v62  ;;  %v523_v51 = vmul.f32 %v976_v12, %v1101_v41  ;;  %v625_v39 = vmul.f32 %v976_v12, %v1103_v42 }
  0x9b   : > { %v666_v8 = vsel %vm657_vm1, %v663_v54, %v665_v45  ;;  %v733_v9 = vadd.f32 %v1127_v59, %v714_v50  ;;  %v608_v13 = vadd.f32 %v564_v5, %v484_v24  ;;  %v1009_v16 = vunpack.i.h.bf16 %v1007_v4 }
  0x9c   : > { %v731_v10 = vadd.f32 %v1127_v59, %v712_v55  ;;  %v732_v11 = vadd.f32 %v1127_v59, %v713_v3  ;;  %v559_v14 = vrot.slane %v523_v51, 1  ;;  %v661_v15 = vrot.slane %v625_v39, 2 }
  0x9d   : > { %v1008_v17 = vunpack.i.l.bf16 %v1007_v4  ;;  %v749_v44 = vpack.c.bf16 %v733_v9, %v733_v9  ;;  %v710_v19 = vadd.f32 %v666_v8, %v608_v13  ;;  %v496_v36 = vmul.f32 %v1009_v16, %v1105_v46 }
  0x9e   : > { %v747_v18 = vpack.c.bf16 %v731_v10, %v731_v10  ;;  %v748_v45 = vpack.c.bf16 %v732_v11, %v732_v11  ;;  %v560_v12 = vsel %vm555_vm0, %v557_v47, %v559_v14  ;;  %v562_v20 = vsel %vm555_vm0, %v559_v14, %v561_v2 }
  0x9f   : > { %v662_v21 = vsel %vm657_vm1, %v659_v53, %v661_v15  ;;  %v664_v22 = vsel %vm657_vm1, %v661_v15, %v663_v54  ;;  %766 = vst.msk [vmem:[%s1150_s12 + $0x1c] sm:$0xf] %vm758_vm2, %v749_v44  ;;  %v729_v23 = vadd.f32 %v1127_v59, %v710_v19  ;;  %v606_v24 = vadd.f32 %v560_v12, %v1202_v58 }
  0xa0   : > { %v607_v26 = vadd.f32 %v562_v20, %v483_v38  ;;  %764 = vst.msk [vmem:[%s1150_s12 + $0x14] sm:$0xf] %vm758_vm2, %v747_v18  ;;  %v536_v47 = vmul.f32 %v1009_v16, %v1101_v41  ;;  %v638_v40 = vmul.f32 %v1009_v16, %v1103_v42  ;;  %v495_v53 = vmul.f32 %v1008_v17, %v1105_v46 }
  0xa1   : > { %v535_v28 = vmul.f32 %v1008_v17, %v1101_v41  ;;  %765 = vst.msk [vmem:[%s1150_s12 + $0x18] sm:$0xf] %vm758_vm2, %v748_v45  ;;  %v745_v29 = vpack.c.bf16 %v729_v23, %v729_v23  ;;  %v708_v30 = vadd.f32 %v662_v21, %v606_v24  ;;  %v637_v31 = vmul.f32 %v1008_v17, %v1103_v42 }
  0xa2   : > { %v709_v58 = vadd.f32 %v664_v22, %v607_v26  ;;  %v585_v32 = vrot.slane %v536_v47, 1  ;;  %v687_v33 = vrot.slane %v638_v40, 2  ;;  %v1004_v35 = vunpack.i.h.bf16 %v1002_v27 }
  0xa3   : > { %v583_v34 = vrot.slane %v535_v28, 1  ;;  %762 = vst.msk [vmem:[%s1150_s12 + $0xc] sm:$0xf] %vm758_vm2, %v745_v29  ;;  %v727_v48 = vadd.f32 %v1127_v59, %v708_v30  ;;  %v685_v56 = vrot.slane %v637_v31, 2  ;;  %v1003_v57 = vunpack.i.l.bf16 %v1002_v27 }
  0xa4   : > { %v728_v52 = vadd.f32 %v1127_v59, %v709_v58  ;;  %v689_v60 = vrot.slane %v1185_v37, 2  ;;  %v588_v62 = vsel %vm555_vm0, %v585_v32, %v587_v43  ;;  %v534_v38 = vmul.f32 %v1004_v35, %v1101_v41 }
  0xa5   : > { %v586_v63 = vsel %vm555_vm0, %v583_v34, %v585_v32  ;;  %v743_v49 = vpack.c.bf16 %v727_v48, %v727_v48  ;;  %v620_v54 = vadd.f32 %v588_v62, %v496_v36  ;;  %v688_v3 = vsel %vm657_vm1, %v685_v56, %v687_v33 }
  0xa6   : > { %v744_v2 = vpack.c.bf16 %v728_v52, %v728_v52  ;;  %v619_v50 = vadd.f32 %v586_v63, %v495_v53  ;;  %v690_v55 = vsel %vm657_vm1, %v687_v33, %v689_v60  ;;  %v636_v4 = vmul.f32 %v1004_v35, %v1103_v42 }
  0xa7   : > { %760 = vst.msk [vmem:[%s1150_s12 + $0x4] sm:$0xf] %vm758_vm2, %v743_v49  ;;  %v722_v25 = vadd.f32 %v690_v55, %v620_v54  ;;  %v533_v43 = vmul.f32 %v1003_v57, %v1101_v41  ;;  %v635_v5 = vmul.f32 %v1003_v57, %v1103_v42  ;;  %v494_v8 = vmul.f32 %v1004_v35, %v1105_v46 }
  0xa8   : > { %v721_v37 = vadd.f32 %v688_v3, %v619_v50  ;;  %761 = vst.msk [vmem:[%s1150_s12 + $0x8] sm:$0xf] %vm758_vm2, %v744_v2  ;;  %v581_v51 = vrot.slane %v534_v38, 1  ;;  %v683_v39 = vrot.slane %v636_v4, 2  ;;  %v492_v14 = vmul.f32 %v1129_v61, %v1105_v46 }
  0xa9   : > { %v741_v9 = vadd.f32 %v1127_v59, %v722_v25  ;;  %v579_v11 = vrot.slane %v533_v43, 1  ;;  %v681_v13 = vrot.slane %v635_v5, 2  ;;  %v493_v42 = vmul.f32 %v1003_v57, %v1105_v46 }
  0xaa   : > { %v740_v10 = vadd.f32 %v1127_v59, %v721_v37  ;;  %v584_v41 = vsel %vm555_vm0, %v581_v51, %v583_v34  ;;  %v686_v18 = vsel %vm657_vm1, %v683_v39, %v685_v56 }
  0xab   : > { %v757_v15 = vpack.c.bf16 %v741_v9, %v741_v9  ;;  %v618_v17 = vadd.f32 %v584_v41, %v494_v8  ;;  %v580_v44 = vsel %vm555_vm0, %v577_v6, %v579_v11  ;;  %v582_v45 = vsel %vm555_vm0, %v579_v11, %v581_v51 }
  0xac   : > { %v756_v16 = vpack.c.bf16 %v740_v10, %v740_v10  ;;  %v616_v19 = vadd.f32 %v580_v44, %v492_v14  ;;  %v617_v12 = vadd.f32 %v582_v45, %v493_v42  ;;  %v682_v46 = vsel %vm657_vm1, %v679_v7, %v681_v13 }
  0xad   : > { %774 = vst.msk [vmem:[%s1150_s12 + $0x3c] sm:$0xf] %vm758_vm2, %v757_v15  ;;  %v720_v61 = vadd.f32 %v686_v18, %v618_v17  ;;  %v684_v0 = vsel %vm657_vm1, %v681_v13, %v683_v39 }
  0xae   : > { %773 = vst.msk [vmem:[%s1150_s12 + $0x38] sm:$0xf] %vm758_vm2, %v756_v16  ;;  %v718_v6 = vadd.f32 %v682_v46, %v616_v19  ;;  %v719_v21 = vadd.f32 %v684_v0, %v617_v12 }
  0xaf   : > { %v739_v20 = vadd.f32 %v1127_v59, %v720_v61 }
  0xb0   : > { %v737_v22 = vadd.f32 %v1127_v59, %v718_v6  ;;  %v738_v24 = vadd.f32 %v1127_v59, %v719_v21 }
  0xb1   : > { %v755_v23 = vpack.c.bf16 %v739_v20, %v739_v20 }
  0xb2   : > { %v753_v26 = vpack.c.bf16 %v737_v22, %v737_v22  ;;  %v754_v36 = vpack.c.bf16 %v738_v24, %v738_v24 }
  0xb3   : > { %772 = vst.msk [vmem:[%s1150_s12 + $0x34] sm:$0xf] %vm758_vm2, %v755_v23 }
  0xb4   : > { %770 = vst.msk [vmem:[%s1150_s12 + $0x2c] sm:$0xf] %vm758_vm2, %v753_v26 }
  0xb5   : > { %771 = vst.msk [vmem:[%s1150_s12 + $0x30] sm:$0xf] %vm758_vm2, %v754_v36 }
  0xb6 PF: > { %s14_s17 = sadd.s32 1, %s1033_s17   ;;  %s1329_s15 = smov %s1029_s16 }
  0xb7   : > { %p11_p5 = scmp.ge.s32.totalorder %s14_s17, 4   ;;  %s1330_s16 = smov %s1332_s18 }
  0xb9   :  { %13 = sbr.rel (!%p11_p5) target bundleno = 2 (0x2), region = 69 }

</bundles_post_ra>
